<compile_context>
chip_gen: v5e
topology: v5e:2x2
jax: 0.10.0
libtpu: 0.0.40
codegen_flags: <defaults>
</compile_context>

<pallas_src>
import functools

import jax
import jax.numpy as jnp
from jax.experimental import pallas as pl
from jax.experimental.pallas import tpu as pltpu

H1, H2, H3 = 128, 64, 1   # hidden sizes from DefaultNetH
NPAD = 128                # lane-dense padding for the (., 1) output


def _mlp_eval_kernel(x_ref, w1_ref, w2_ref, w3_ref, o_ref):
    # linear1 (no bias) + relu
    h = jnp.dot(x_ref[...], w1_ref[...], preferred_element_type=jnp.float32)
    h = jnp.maximum(h, 0.0)
    # linear2 (no bias) + relu
    h = jnp.dot(h.astype(jnp.bfloat16), w2_ref[...],
                preferred_element_type=jnp.float32)
    h = jnp.maximum(h, 0.0)
    # linear3 (no bias, padded to 128 output lanes) + relu
    o = jnp.dot(h.astype(jnp.bfloat16), w3_ref[...],
                preferred_element_type=jnp.float32)
    o_ref[...] = jnp.maximum(o, 0.0)


def _mlp_train_kernel(x_ref, w1_ref, w2_ref, w3_ref, mask_ref, o_ref):
    h = jnp.dot(x_ref[...], w1_ref[...], preferred_element_type=jnp.float32)
    h = jnp.maximum(h, 0.0)
    h = jnp.dot(h.astype(jnp.bfloat16), w2_ref[...],
                preferred_element_type=jnp.float32)
    h = jnp.maximum(h, 0.0)
    # inverted dropout: mask is pre-scaled to {0, 1/(1-p)} in f32
    h = h * mask_ref[...]
    o = jnp.dot(h.astype(jnp.bfloat16), w3_ref[...],
                preferred_element_type=jnp.float32)
    o_ref[...] = jnp.maximum(o, 0.0)


def default_net_h(x, w1, w2, w3, *, training=False, dropout_rng=None, p=0.5):
    """Forward pass of DefaultNetH as a fused Pallas TPU kernel.

    Args:
      x:  (B, F) float32
      w1: (F, 128) float32   (transposed PyTorch weight)
      w2: (128, 64) float32
      w3: (64, 1)  float32
    Returns:
      (B, 1) float32
    """
    B, F = x.shape
    assert w1.shape == (F, H1) and w2.shape == (H1, H2) and w3.shape == (H2, H3)

    # Batch tile: whole batch if small, else 512-row tiles (fills the MXU and
    # keeps per-step VMEM footprint far below the 64 MiB v7x budget).
    TM = B if B <= 512 else 512
    grid = (pl.cdiv(B, TM),)

    # bf16 MXU operands; accumulation stays f32 inside the kernel.
    x_b = x.astype(jnp.bfloat16)
    w1_b = w1.astype(jnp.bfloat16)
    w2_b = w2.astype(jnp.bfloat16)
    # Zero-pad the (64, 1) weight to (64, 128) -> lane-dense output stores.
    w3_b = jnp.zeros((H2, NPAD), jnp.bfloat16).at[:, :H3].set(
        w3.astype(jnp.bfloat16))

    x_spec = pl.BlockSpec((TM, F), lambda i: (i, 0))
    w_specs = [
        pl.BlockSpec((F, H1), lambda i: (0, 0)),
        pl.BlockSpec((H1, H2), lambda i: (0, 0)),
        pl.BlockSpec((H2, NPAD), lambda i: (0, 0)),
    ]
    out_spec = pl.BlockSpec((TM, NPAD), lambda i: (i, 0))
    out_shape = jax.ShapeDtypeStruct((B, NPAD), jnp.float32)
    cparams = pltpu.CompilerParams(dimension_semantics=("parallel",))

    if training:
        if dropout_rng is None:
            dropout_rng = jax.random.PRNGKey(0)
        keep = jax.random.bernoulli(dropout_rng, 1.0 - p, (B, H2))
        mask = keep.astype(jnp.float32) * (1.0 / (1.0 - p))
        out = pl.pallas_call(
            _mlp_train_kernel,
            out_shape=out_shape,
            grid=grid,
            in_specs=[x_spec, *w_specs,
                      pl.BlockSpec((TM, H2), lambda i: (i, 0))],
            out_specs=out_spec,
            compiler_params=cparams,
        )(x_b, w1_b, w2_b, w3_b, mask)
    else:
        out = pl.pallas_call(
            _mlp_eval_kernel,
            out_shape=out_shape,
            grid=grid,
            in_specs=[x_spec, *w_specs],
            out_specs=out_spec,
            compiler_params=cparams,
        )(x_b, w1_b, w2_b, w3_b)

    # drop the padded lanes -> (B, 1)
    return out[:, :H3]


def _init_linear_weight(key, in_features, out_features):
    # PyTorch nn.Linear default init: U(-1/sqrt(in), 1/sqrt(in)); stored here
    # already transposed to (in, out).
    bound = 1.0 / jnp.sqrt(jnp.float32(in_features))
    return jax.random.uniform(
        key, (in_features, out_features), dtype=jnp.float32,
        minval=-bound, maxval=bound)


def _reference(x, w1, w2, w3, mask=None):
    """Pure-JAX reference with the same bf16 matmul / f32 accumulate recipe."""
    h = jnp.dot(x.astype(jnp.bfloat16), w1.astype(jnp.bfloat16),
                preferred_element_type=jnp.float32)
    h = jnp.maximum(h, 0.0)
    h = jnp.dot(h.astype(jnp.bfloat16), w2.astype(jnp.bfloat16),
                preferred_element_type=jnp.float32)
    h = jnp.maximum(h, 0.0)
    if mask is not None:
        h = h * mask
    o = jnp.dot(h.astype(jnp.bfloat16), w3.astype(jnp.bfloat16),
                preferred_element_type=jnp.float32)
    return jnp.maximum(o, 0.0)


if __name__ == "__main__":
    key = jax.random.PRNGKey(0)
    k_x, k1, k2, k3, k_drop = jax.random.split(key, 5)

    B = 8            # batch
    x_features = 32  # in_features of linear1

    x = jax.random.normal(k_x, (B, x_features), dtype=jnp.float32)
    w1 = _init_linear_weight(k1, x_features, H1)
    w2 = _init_linear_weight(k2, H1, H2)
    w3 = _init_linear_weight(k3, H2, H3)

    # Eval mode (dropout = identity), matching module.eval() semantics.
    out = jax.block_until_ready(default_net_h(x, w1, w2, w3, training=False))
    ref = _reference(x, w1, w2, w3)
    assert out.shape == (B, H3)
    assert jnp.allclose(out, ref, atol=1e-2, rtol=1e-2)

    # Training mode (dropout active); check against the same host-side mask.
    out_train = jax.block_until_ready(
        default_net_h(x, w1, w2, w3, training=True, dropout_rng=k_drop))
    keep = jax.random.bernoulli(k_drop, 0.5, (B, H2))
    mask = keep.astype(jnp.float32) * 2.0
    ref_train = _reference(x, w1, w2, w3, mask=mask)
    assert out_train.shape == (B, H3)
    assert jnp.allclose(out_train, ref_train, atol=1e-2, rtol=1e-2)

    print("KERNEL_OK")
</pallas_src>

<mosaic_0001>
module attributes {stable_mosaic.version = 11 : i64} {
  func.func @_mlp_eval_kernel(%arg0: i32, %arg1: memref<8x32xbf16, #tpu.memory_space<vmem>>, %arg2: memref<32x128xbf16, #tpu.memory_space<vmem>>, %arg3: memref<128x64xbf16, #tpu.memory_space<vmem>>, %arg4: memref<64x128xbf16, #tpu.memory_space<vmem>>, %arg5: memref<8x128xf32, #tpu.memory_space<vmem>>) attributes {dimension_semantics = [#tpu.dimension_semantics<parallel>], iteration_bounds = array<i64: 1>, scalar_prefetch = 0 : i64, scratch_operands = 0 : i64, tpu.core_type = #tpu.core_type<tc>, window_params = [{transform_indices = @transform_0, window_bounds = array<i64: 8, 32>}, {pipeline_mode = #tpu.pipeline_mode<synchronous>, transform_indices = @transform_1, window_bounds = array<i64: 32, 128>}, {pipeline_mode = #tpu.pipeline_mode<synchronous>, transform_indices = @transform_2, window_bounds = array<i64: 128, 64>}, {pipeline_mode = #tpu.pipeline_mode<synchronous>, transform_indices = @transform_3, window_bounds = array<i64: 64, 128>}, {transform_indices = @transform_4, window_bounds = array<i64: 8, 128>}]} {
    %c0 = arith.constant 0 : index
    %c0_0 = arith.constant 0 : index
    %0 = vector.load %arg1[%c0, %c0_0] : memref<8x32xbf16, #tpu.memory_space<vmem>>, vector<8x32xbf16>
    %c0_1 = arith.constant 0 : index
    %c0_2 = arith.constant 0 : index
    %1 = vector.load %arg2[%c0_1, %c0_2] : memref<32x128xbf16, #tpu.memory_space<vmem>>, vector<32x128xbf16>
    %cst = arith.constant dense<0.000000e+00> : vector<8x128xf32>
    %2 = tpu.matmul %0, %1, %cst {dimension_numbers = #tpu.dot_dimension_numbers<[1], [0], [0], [1], [0, 0, 1, 1], [], []>} : vector<8x32xbf16>, vector<32x128xbf16>, vector<8x128xf32> -> vector<8x128xf32>
    %cst_3 = arith.constant 0.000000e+00 : f32
    %3 = vector.broadcast %cst_3 : f32 to vector<8x128xf32>
    %4 = arith.maximumf %2, %3 : vector<8x128xf32>
    %5 = arith.truncf %4 : vector<8x128xf32> to vector<8x128xbf16>
    %c0_4 = arith.constant 0 : index
    %c0_5 = arith.constant 0 : index
    %6 = vector.load %arg3[%c0_4, %c0_5] : memref<128x64xbf16, #tpu.memory_space<vmem>>, vector<128x64xbf16>
    %cst_6 = arith.constant dense<0.000000e+00> : vector<8x64xf32>
    %7 = tpu.matmul %5, %6, %cst_6 {dimension_numbers = #tpu.dot_dimension_numbers<[1], [0], [0], [1], [0, 0, 1, 1], [], []>} : vector<8x128xbf16>, vector<128x64xbf16>, vector<8x64xf32> -> vector<8x64xf32>
    %cst_7 = arith.constant 0.000000e+00 : f32
    %8 = vector.broadcast %cst_7 : f32 to vector<8x64xf32>
    %9 = arith.maximumf %7, %8 : vector<8x64xf32>
    %10 = arith.truncf %9 : vector<8x64xf32> to vector<8x64xbf16>
    %c0_8 = arith.constant 0 : index
    %c0_9 = arith.constant 0 : index
    %11 = vector.load %arg4[%c0_8, %c0_9] : memref<64x128xbf16, #tpu.memory_space<vmem>>, vector<64x128xbf16>
    %cst_10 = arith.constant dense<0.000000e+00> : vector<8x128xf32>
    %12 = tpu.matmul %10, %11, %cst_10 {dimension_numbers = #tpu.dot_dimension_numbers<[1], [0], [0], [1], [0, 0, 1, 1], [], []>} : vector<8x64xbf16>, vector<64x128xbf16>, vector<8x128xf32> -> vector<8x128xf32>
    %cst_11 = arith.constant 0.000000e+00 : f32
    %13 = vector.broadcast %cst_11 : f32 to vector<8x128xf32>
    %14 = arith.maximumf %12, %13 : vector<8x128xf32>
    %c0_12 = arith.constant 0 : index
    %c0_13 = arith.constant 0 : index
    %15 = vector.load %arg5[%c0_12, %c0_13] : memref<8x128xf32, #tpu.memory_space<vmem>>, vector<8x128xf32>
    tpu.vector_store %arg5[%c0_12, %c0_13], %14 {strides = array<i32>} : memref<8x128xf32, #tpu.memory_space<vmem>>, vector<8x128xf32>,
    return
  }
  func.func @transform_0(%arg0: i32) -> (i32, i32) {
    %c0_i32 = arith.constant 0 : i32
    %c0_i32_0 = arith.constant 0 : i32
    return %arg0, %c0_i32 : i32, i32
  }
  func.func @transform_1(%arg0: i32) -> (i32, i32) {
    %c0_i32 = arith.constant 0 : i32
    %c0_i32_0 = arith.constant 0 : i32
    %c0_i32_1 = arith.constant 0 : i32
    return %c0_i32, %c0_i32_0 : i32, i32
  }
  func.func @transform_2(%arg0: i32) -> (i32, i32) {
    %c0_i32 = arith.constant 0 : i32
    %c0_i32_0 = arith.constant 0 : i32
    %c0_i32_1 = arith.constant 0 : i32
    return %c0_i32, %c0_i32_0 : i32, i32
  }
  func.func @transform_3(%arg0: i32) -> (i32, i32) {
    %c0_i32 = arith.constant 0 : i32
    %c0_i32_0 = arith.constant 0 : i32
    %c0_i32_1 = arith.constant 0 : i32
    return %c0_i32, %c0_i32_0 : i32, i32
  }
  func.func @transform_4(%arg0: i32) -> (i32, i32) {
    %c0_i32 = arith.constant 0 : i32
    %c0_i32_0 = arith.constant 0 : i32
    return %arg0, %c0_i32 : i32, i32
  }
}

</mosaic_0001>

<bundles_post_ra>
// kernel: tpu_custom_call.1
= control target key start
LH: loop header
LB: loop body
LE: loop exit
PB: predicated region body
PF: predicated region fallthrough
CT: control target
= control target key end

     0   :  { %s374_s0 = inlined_call_operand.vmem [shape: bf16[8,32], index: 0, kind: input, shape index: {}]   ;;  %s375_s1 = inlined_call_operand.vmem [shape: bf16[32,128], index: 1, kind: input, shape index: {}]   ;;  %s376_s2 = inlined_call_operand.vmem [shape: bf16[128,64], index: 2, kind: input, shape index: {}]   ;;  %s377_s3 = inlined_call_operand.vmem [shape: bf16[64,128], index: 3, kind: input, shape index: {}]   ;;  %s378_s4 = inlined_call_operand.hbm [shape: f32[8,128], index: 4, kind: output, shape index: {}]  }
   0x1   :  { %v260_v0 = vld [vmem:[%s375_s1 + $0x8] sm:$0xff]  ;;  %v268_v1 = vld [vmem:[%s376_s2 + $0x38] sm:$0xff]  ;;  %v259_v2 = vld [vmem:[%s375_s1] sm:$0xff] }
   0x2   :  { %46 = vmatpush.bf16.msra.mxu0 %v260_v0  ;;  %119 = vmatpush.bf16.msra.mxu1 %v268_v1  ;;  %v267_v3 = vld [vmem:[%s376_s2 + $0x30] sm:$0xff] }
   0x3   :  { %9 = vsyncpa [#allocation3], 0  ;;  %v19_v4 = vld [vmem:[%s374_s0] sm:$0xf]  ;;  %vm36_vm0 = vcmask 261120   ;;  %v266_v5 = vld [vmem:[%s376_s2 + $0x28] sm:$0xff] }
   0x4   :  { %v265_v6 = vld [vmem:[%s376_s2 + $0x20] sm:$0xff]  ;;  %v264_v7 = vld [vmem:[%s376_s2 + $0x18] sm:$0xff]  ;;  %v263_v8 = vld [vmem:[%s376_s2 + $0x10] sm:$0xff]  ;;  %vm166_vm1 = vcmask 523264   ;;  %s300_s16 = smov [#allocation2]   ;;  %s192_s20 = sshll.u32 %s378_s4, 4  ;;  %s193_s20 = int_to_ptr.hbm [resolvable:$true] %s192_s20 }
   0x5   :  { %v262_v9 = vld [vmem:[%s376_s2 + $0x8] sm:$0xff]  ;;  %v261_v10 = vld [vmem:[%s376_s2] sm:$0xff]  ;;  %v272_v11 = vld [vmem:[%s377_s3 + $0x18] sm:$0xff]  ;;  %s190_s17 = sshll.u32 %s300_s16, 4  ;;  %s191_s17 = int_to_ptr.vmem [resolvable:$true] %s190_s17 }
   0x6   :  { %47 = vmatpush.bf16.msra.mxu0 %v259_v2  ;;  %120 = vmatpush.bf16.msra.mxu1 %v267_v3  ;;  %v271_v12 = vld [vmem:[%s377_s3 + $0x10] sm:$0xff]  ;;  %v270_v13 = vld [vmem:[%s377_s3 + $0x8] sm:$0xff]  ;;  %v269_v18 = vld [vmem:[%s377_s3] sm:$0xff] }
   0x7   :  { %174 = vmatpush.bf16.msra.mxu2 %v272_v11 }
   0x9   :  { %209 = vmatmul.msk.bf16.vlgmr.msra.gmra.mxu0 %vm36_vm0, %v19_v4 }
   0xa   :  { %121 = vmatpush.bf16.msra.mxu1 %v266_v5 }
   0xb   :  { %175 = vmatpush.bf16.msra.mxu2 %v271_v12 }
   0xe   :  { %122 = vmatpush.bf16.msra.mxu1 %v265_v6 }
   0xf   :  { %176 = vmatpush.bf16.msra.mxu2 %v270_v13 }
  0x12   :  { %123 = vmatpush.bf16.msra.mxu1 %v264_v7 }
  0x13   :  { %177 = vmatpush.bf16.msra.mxu2 %v269_v18 }
  0x16   :  { %124 = vmatpush.bf16.msra.mxu1 %v263_v8 }
  0x1a   :  { %125 = vmatpush.bf16.msra.mxu1 %v262_v9 }
  0x1e   :  { %126 = vmatpush.bf16.msra.mxu1 %v261_v10 }
  0x86   :  { %v49_v14 = vpop.f32.mrf.mxu0 }
  0x87   :  { %v53_v15 = vmax.f32 %v49_v14, 0.0 }
  0x89   :  { %v54_v16 = vpack.c.bf16 %v53_v15, %v53_v15 }
  0x8b   :  { %127 = vmatmul.bf16.vlgmr.msra.gmra.mxu1 %v54_v16 }
  0x8e   :  { %v51_v17 = vpop.f32.mrf.mxu0 }
 0x108   :  { %v128_v19 = vpop.f32.mrf.mxu1 }
 0x109   :  { %v132_v20 = vmax.f32 %v128_v19, 0.0 }
 0x10b   :  { %v133_v21 = vpack.c.bf16 %v132_v20, %v132_v20 }
 0x10d   :  { %258 = vmatmul.msk.bf16.vlgmr.msra.gmra.mxu2 %vm166_vm1, %v133_v21 }
 0x110   :  { %v130_v22 = vpop.f32.mrf.mxu1 }
 0x190   :  { %v179_v23 = vpop.f32.mrf.mxu2 }
 0x191   :  { %v183_v24 = vmax.f32 %v179_v23, 0.0 }
 0x193   :  { %184 = vst [vmem:[#allocation2] sm:$0xff] %v183_v24 }
 0x194   :  { %195 = dma.vmem_to_hbm [thread:$0]  %s191_s17, 128, %s193_s20, [#allocation3]  }
 0x198   :  { %v181_v25 = vpop.f32.mrf.mxu2 }
 0x199   :  { %298 = dma.done.wait [#allocation3], 128  }
 0x19a   :  { %299 = vsyncadd [#allocation3], 4294967168 }
 0x19b   :  { %200 = vsyncpa [#allocation3], 1 }

</bundles_post_ra>
